<compile_context>
chip_gen: v6e
topology: v6e:2x2x1
jax: 0.10.0
libtpu: 0.0.40
codegen_flags: <defaults>
</compile_context>

<pallas_src>
import math

import jax
import jax.numpy as jnp
from jax.experimental import pallas as pl
from jax.experimental.pallas import tpu as pltpu


def _posenc_add_kernel(x_ref, pe_ref, o_ref):
    # x_ref: (BB, TS, DL), pe_ref: (TS, DL) already in x dtype, o_ref: (BB, TS, DL)
    o_ref[...] = x_ref[...] + pe_ref[...][None, :, :]


def make_positional_encoding(max_seq_len, d_model, dtype=jnp.float32):
    """Same table as the PyTorch module's `pe` buffer, shape [max_seq_len, d_model]."""
    position = jnp.arange(max_seq_len, dtype=jnp.float32)[:, None]                 # [L, 1]
    div_term = jnp.exp(
        jnp.arange(0, d_model, 2, dtype=jnp.float32) * (-math.log(10000.0) / d_model)
    )                                                                              # [ceil(D/2)]
    angles = position * div_term                                                   # [L, ceil(D/2)]
    pe = jnp.zeros((max_seq_len, d_model), dtype=jnp.float32)
    pe = pe.at[:, 0::2].set(jnp.sin(angles))
    pe = pe.at[:, 1::2].set(jnp.cos(angles[:, : d_model // 2]))  # odd d_model safe
    return pe.astype(dtype)


def _physical_vmem_bytes():
    """Best-effort physical VMEM query; conservative (v7x per-TC) fallback."""
    try:
        info = pltpu.get_tpu_info()
        for attr in ("vmem_capacity_bytes", "vmem_bytes", "vmem_size_bytes"):
            v = getattr(info, attr, None)
            if v:
                return int(v)
    except Exception:
        pass
    return 64 << 20


def add_positional_encoding(x, pe_table, *, block_seq=None):
    """x: [batch, seq, d_model]; pe_table: [max_seq_len, d_model]. Returns x + pe[:seq]."""
    b, s, d = x.shape
    assert pe_table.shape[1] == d and pe_table.shape[0] >= s, "pe table too small"
    # Cast once wrapper-side: removes per-tile VPU cast and (for bf16 x) halves pe DMA bytes.
    pe = pe_table[:s].astype(x.dtype)  # [s, d]

    # --- lane-dense repack: fold k seq rows into the lane dim when d % 128 != 0 ---
    fold = 1
    if d % 128 != 0:
        k = (128 * d) // math.gcd(128, d) // d  # smallest k with (k*d) % 128 == 0
        if k > 1 and s % k == 0:
            fold = k
    s_f, d_f = s // fold, d * fold
    if fold > 1:
        x = x.reshape(b, s_f, d_f)       # contiguous, free reshape
        pe = pe.reshape(s_f, d_f)

    itemsize = jnp.dtype(x.dtype).itemsize

    # --- generation-aware VMEM budget / tile target ---
    phys_vmem = _physical_vmem_bytes()
    if phys_vmem >= (128 << 20):         # v5e / v6e: 128 MiB physical VMEM
        vmem_limit = 64 << 20
        target_tile = 8 << 20
    else:                                # v7x (64 MiB per TC) or unknown
        vmem_limit = 48 << 20
        target_tile = 4 << 20

    # --- choose batch tile (full batch unless even an 8-row slab over batch is too big) ---
    slab8 = 8 * d_f * itemsize           # one 8-sublane seq slab for one batch element
    if b * slab8 <= target_tile:
        block_b = b
    else:
        block_b = max(1, target_tile // slab8)

    # --- choose seq tile: as big as the budget allows, multiple of 8 sublanes ---
    if block_seq is None:
        row_bytes = block_b * d_f * itemsize
        bs = max(8, (target_tile // max(row_bytes, 1)) // 8 * 8)
        # keep >= a few seq tiles so v7x can shard the 'parallel' axis across both TCs
        if s_f >= 32:
            min_tiles = 4
        elif s_f >= 16:
            min_tiles = 2
        else:
            min_tiles = 1
        cap = max(8, (s_f // min_tiles) // 8 * 8)
        block_seq = min(bs, cap)
    block_seq = max(8, (int(block_seq) // 8) * 8)
    block_seq = min(block_seq, ((s_f + 7) // 8) * 8)

    # No wrapper-side padding / slicing: Pallas masks the partial final blocks.
    grid = (pl.cdiv(b, block_b), pl.cdiv(s_f, block_seq))

    out = pl.pallas_call(
        _posenc_add_kernel,
        out_shape=jax.ShapeDtypeStruct((b, s_f, d_f), x.dtype),
        grid_spec=pltpu.PrefetchScalarGridSpec(
            num_scalar_prefetch=0,
            grid=grid,
            in_specs=[
                pl.BlockSpec((block_b, block_seq, d_f), lambda ib, js: (ib, js, 0)),
                pl.BlockSpec((block_seq, d_f), lambda ib, js: (js, 0)),
            ],
            out_specs=pl.BlockSpec((block_b, block_seq, d_f), lambda ib, js: (ib, js, 0)),
        ),
        compiler_params=pltpu.CompilerParams(
            dimension_semantics=("parallel", "parallel"),
            vmem_limit_bytes=vmem_limit,
        ),
    )(x, pe)

    if fold > 1:
        out = out.reshape(b, s, d)
    return out


def _reference(x, pe_table):
    s = x.shape[1]
    return x + pe_table[:s].astype(x.dtype)[None, :, :]


if __name__ == "__main__":
    # 1) Small shapes consistent with the module's forward.
    batch, seq, d_model, max_seq_len = 2, 8, 128, 64
    key = jax.random.PRNGKey(0)
    x = jax.random.normal(key, (batch, seq, d_model), dtype=jnp.float32)
    pe_table = make_positional_encoding(max_seq_len, d_model)

    out = jax.block_until_ready(add_positional_encoding(x, pe_table))
    ref = _reference(x, pe_table)
    assert out.shape == (batch, seq, d_model)
    assert jnp.allclose(out, ref, atol=1e-6, rtol=1e-6), "mismatch (small)"

    # 2) Ragged seq length: multi-tile grid with a masked partial final block (no pad/slice).
    seq2, max2 = 200, 256
    x2 = jax.random.normal(jax.random.PRNGKey(1), (batch, seq2, d_model), dtype=jnp.float32)
    pe2 = make_positional_encoding(max2, d_model)
    out2 = jax.block_until_ready(add_positional_encoding(x2, pe2))
    assert out2.shape == (batch, seq2, d_model)
    assert jnp.allclose(out2, _reference(x2, pe2), atol=1e-6, rtol=1e-6), "mismatch (ragged)"

    # 3) d_model not a multiple of 128: exercises the lane-dense fold path.
    d3, seq3, max3 = 96, 64, 128
    x3 = jax.random.normal(jax.random.PRNGKey(2), (batch, seq3, d3), dtype=jnp.float32)
    pe3 = make_positional_encoding(max3, d3)
    out3 = jax.block_until_ready(add_positional_encoding(x3, pe3))
    assert out3.shape == (batch, seq3, d3)
    assert jnp.allclose(out3, _reference(x3, pe3), atol=1e-6, rtol=1e-6), "mismatch (fold)"

    # 4) bf16 activations: pe cast happens once wrapper-side; add runs in bf16.
    x4 = jax.random.normal(jax.random.PRNGKey(3), (batch, 16, d_model)).astype(jnp.bfloat16)
    out4 = jax.block_until_ready(add_positional_encoding(x4, pe_table[:64]))
    ref4 = _reference(x4, pe_table[:64])
    assert out4.dtype == jnp.bfloat16
    assert jnp.allclose(out4.astype(jnp.float32), ref4.astype(jnp.float32),
                        atol=1e-2, rtol=1e-2), "mismatch (bf16)"

    print("KERNEL_OK")
</pallas_src>

<mosaic_0001>
module attributes {stable_mosaic.version = 11 : i64} {
  func.func @_posenc_add_kernel(%arg0: i32, %arg1: i32, %arg2: memref<2x8x128xf32, #tpu.memory_space<vmem>>, %arg3: memref<8x128xf32, #tpu.memory_space<vmem>>, %arg4: memref<2x8x128xf32, #tpu.memory_space<vmem>>) attributes {dimension_semantics = [#tpu.dimension_semantics<parallel>, #tpu.dimension_semantics<parallel>], iteration_bounds = array<i64: 1, 1>, scalar_prefetch = 0 : i64, scratch_operands = 0 : i64, tpu.core_type = #tpu.core_type<tc>, window_params = [{transform_indices = @transform_0, window_bounds = array<i64: 2, 8, 128>}, {transform_indices = @transform_1, window_bounds = array<i64: 8, 128>}, {transform_indices = @transform_2, window_bounds = array<i64: 2, 8, 128>}]} {
    %c0 = arith.constant 0 : index
    %c0_0 = arith.constant 0 : index
    %c0_1 = arith.constant 0 : index
    %0 = vector.load %arg2[%c0, %c0_0, %c0_1] : memref<2x8x128xf32, #tpu.memory_space<vmem>>, vector<2x8x128xf32>
    %c0_2 = arith.constant 0 : index
    %c0_3 = arith.constant 0 : index
    %1 = vector.load %arg3[%c0_2, %c0_3] : memref<8x128xf32, #tpu.memory_space<vmem>>, vector<8x128xf32>
    %2 = vector.shape_cast %1 : vector<8x128xf32> to vector<1x8x128xf32>
    %3 = vector.broadcast %2 : vector<1x8x128xf32> to vector<2x8x128xf32>
    %4 = arith.addf %0, %3 : vector<2x8x128xf32>
    %c0_4 = arith.constant 0 : index
    %c0_5 = arith.constant 0 : index
    %c0_6 = arith.constant 0 : index
    %5 = vector.load %arg4[%c0_4, %c0_5, %c0_6] : memref<2x8x128xf32, #tpu.memory_space<vmem>>, vector<2x8x128xf32>
    tpu.vector_store %arg4[%c0_4, %c0_5, %c0_6], %4 {strides = array<i32>} : memref<2x8x128xf32, #tpu.memory_space<vmem>>, vector<2x8x128xf32>,
    return
  }
  func.func @transform_0(%arg0: i32, %arg1: i32) -> (i32, i32, i32) {
    %c0_i32 = arith.constant 0 : i32
    %c0_i32_0 = arith.constant 0 : i32
    return %arg0, %arg1, %c0_i32 : i32, i32, i32
  }
  func.func @transform_1(%arg0: i32, %arg1: i32) -> (i32, i32) {
    %c0_i32 = arith.constant 0 : i32
    %c0_i32_0 = arith.constant 0 : i32
    return %arg1, %c0_i32 : i32, i32
  }
  func.func @transform_2(%arg0: i32, %arg1: i32) -> (i32, i32, i32) {
    %c0_i32 = arith.constant 0 : i32
    %c0_i32_0 = arith.constant 0 : i32
    return %arg0, %arg1, %c0_i32 : i32, i32, i32
  }
}

</mosaic_0001>

<bundles_post_ra>
// kernel: tpu_custom_call.1
= control target key start
LH: loop header
LB: loop body
LE: loop exit
PB: predicated region body
PF: predicated region fallthrough
CT: control target
= control target key end

     0   :  { %7 = vsyncpa [#allocation3], 0  ;;  %s169_s0 = inlined_call_operand.hbm [shape: f32[2,8,128], index: 0, kind: input, shape index: {}]   ;;  %s170_s1 = inlined_call_operand.hbm [shape: f32[8,128], index: 1, kind: input, shape index: {}]   ;;  %s171_s2 = inlined_call_operand.hbm [shape: f32[2,8,128], index: 2, kind: output, shape index: {}]  }
   0x1   :  { %8 = vsyncpa [#allocation6], 0 }
   0x2   :  { %9 = vsyncpa [#allocation4], 0  ;;  %s134_s9 = smov [#allocation2]  }
   0x3   :  { %s15_s10 = sshll.u32 %s134_s9, 4  ;;  %s16_s10 = int_to_ptr.vmem [resolvable:$true] %s15_s10 }
   0x4   :  { %s76_s11 = scalar_lea.vmem %s16_s10, 256  ;;  %p81_p1 = scmp.lt.s32.totalorder %s16_s10, %s16_s10 }
   0x5   :  { %p77_p0 = scmp.ne.s32.totalorder %s16_s10, %s76_s11  ;;  %p82_p2 = scmp.lt.s32.totalorder %s76_s11, %s76_s11 }
   0x7   :  { %p83_p3 = por %p82_p2, %p81_p1 }
   0x9   :  { %p84_p4 = pnand %p83_p3, %p77_p0 }
   0xb   :  { %87 = shalt.err (!%p84_p4)
}
   0xc   :  { %s135_s12 = smov 128   ;;  %s136_s13 = smov 8  }
   0xd   :  { %21 = dma.hbm_to_vmem [thread:$0]  %s169_s0, 256, %s16_s10, [#allocation3], %s135_s12, %s135_s12, %s136_s13  }
   0xe   :  { %s137_s16 = smov [#allocation5]  }
   0xf   :  { %s28_s17 = sshll.u32 %s137_s16, 4  ;;  %s29_s17 = int_to_ptr.vmem [resolvable:$true] %s28_s17 }
  0x10   :  { %s96_s18 = scalar_lea.vmem %s29_s17, 128  ;;  %p101_p6 = scmp.lt.s32.totalorder %s29_s17, %s29_s17 }
  0x11   :  { %p97_p5 = scmp.ne.s32.totalorder %s29_s17, %s96_s18  ;;  %p102_p7 = scmp.lt.s32.totalorder %s96_s18, %s96_s18 }
  0x13   :  { %p103_p8 = por %p102_p7, %p101_p6 }
  0x15   :  { %p104_p9 = pnand %p103_p8, %p97_p5 }
  0x17   :  { %107 = shalt.err (!%p104_p9)
}
  0x18   :  { %31 = dma.hbm_to_vmem [thread:$0]  %s170_s1, 128, %s29_s17, [#allocation6]  }
  0x19   :  { %128 = dma.done.wait [#allocation3], 256  }
  0x1a   :  { %129 = vsyncadd [#allocation3], 4294967040 }
  0x1b   :  { %130 = dma.done.wait [#allocation6], 128  }
  0x1c   :  { %131 = vsyncadd [#allocation6], 4294967168  ;;  %s138_s21 = smov [#allocation7]   ;;  %v38_v0 = vld [vmem:[#allocation2] sm:$0xff]  ;;  %v40_v1 = vld [vmem:[#allocation5] sm:$0xff] }
  0x1d   :  { %s50_s0 = sshll.u32 %s138_s21, 4  ;;  %v39_v2 = vld [vmem:[#allocation2 + $0x8] sm:$0xff]  ;;  %v41_v3 = vadd.f32 %v40_v1, %v38_v0  ;;  %s51_s0 = int_to_ptr.vmem [resolvable:$true] %s50_s0 }
  0x1e   :  { %v42_v4 = vadd.f32 %v40_v1, %v39_v2  ;;  %s108_s22 = scalar_lea.vmem %s51_s0, 256  ;;  %p113_p11 = scmp.lt.s32.totalorder %s51_s0, %s51_s0 }
  0x1f   :  { %43 = vst [vmem:[#allocation7] sm:$0xff] %v41_v3  ;;  %p109_p10 = scmp.ne.s32.totalorder %s51_s0, %s108_s22  ;;  %p114_p12 = scmp.lt.s32.totalorder %s108_s22, %s108_s22 }
  0x20   :  { %44 = vst [vmem:[#allocation7 + $0x8] sm:$0xff] %v42_v4 }
  0x21   :  { %p115_p13 = por %p114_p12, %p113_p11 }
  0x23   :  { %p116_p0 = pnand %p115_p13, %p109_p10 }
  0x25   :  { %119 = shalt.err (!%p116_p0)
}
  0x26   :  { %56 = dma.vmem_to_hbm [thread:$0]  %s51_s0, 256, %s171_s2, [#allocation4], %s135_s12, %s135_s12, %s136_s13  }
  0x27   :  { %132 = dma.done.wait [#allocation4], 256  }
  0x28   :  { %133 = vsyncadd [#allocation4], 4294967040 }
  0x29   :  { %60 = vsyncpa [#allocation3], 1 }
  0x2a   :  { %61 = vsyncpa [#allocation6], 1 }
  0x2b   :  { %62 = vsyncpa [#allocation4], 1 }

</bundles_post_ra>
